<compile_context>
chip_gen: v6e
topology: v6e:2x2x1
jax: 0.10.0
libtpu: 0.0.40
codegen_flags: <defaults>
</compile_context>

<pallas_src>
import jax
import jax.numpy as jnp
from jax.experimental import pallas as pl
from jax.experimental.pallas import tpu as pltpu


def mlp_kernel(xT_ref, w1_ref, b1_ref, w2_ref, b2_ref, w3_ref, b3_ref,
               w4_ref, b4_ref, o_ref):
    # Transposed layout: features on sublanes, batch on lanes.
    xT = xT_ref[...]                                                   # (D, tm)

    h1 = jnp.dot(w1_ref[...], xT, preferred_element_type=jnp.float32)  # (128, tm)
    h1 = jnp.maximum(h1 + b1_ref[...], 0.0)

    h2 = jnp.dot(w2_ref[...], h1, preferred_element_type=jnp.float32)  # (64, tm)
    h2 = jnp.maximum(h2 + b2_ref[...], 0.0)

    h3 = jnp.dot(w3_ref[...], h2, preferred_element_type=jnp.float32)  # (32, tm)
    h3 = jnp.maximum(h3 + b3_ref[...], 0.0)

    # Final 32 -> 1 layer on the VPU/XLU instead of an N=1 MXU matmul:
    # weighted sublane reduce; result is already lane-dense (1, tm).
    y = jnp.sum(h3 * w4_ref[...], axis=0, keepdims=True) + b4_ref[...]
    o_ref[...] = y.astype(o_ref.dtype)


def _pick_batch_tile(batch):
    """MXU-aligned batch tile: always a multiple of 128 (v5e MXU rows; also fine
    for v6e/v7x), capped at 512 so intermediates stay small and multi-tile grids
    can still split across v7x's two TensorCores."""
    padded128 = pl.cdiv(batch, 128) * 128
    tm = min(512, padded128)
    b_pad = pl.cdiv(batch, tm) * tm
    return tm, b_pad


def temperature_model_forward(x, params):
    """x: (B, input_size) float32.  params: dict (see init_params)."""
    B, D = x.shape
    tm, b_pad = _pick_batch_tile(B)

    if b_pad != B:
        x = jnp.pad(x, ((0, b_pad - B), (0, 0)))       # zero-pad extra rows
    xT = x.T                                           # (D, b_pad): batch -> lanes

    w1, b1 = params["w1"], params["b1"]   # (128, D), (128, 1)
    w2, b2 = params["w2"], params["b2"]   # (64, 128), (64, 1)
    w3, b3 = params["w3"], params["b3"]   # (32, 64),  (32, 1)
    w4, b4 = params["w4"], params["b4"]   # (32, 1),   (1, 1)

    full = lambda a: pl.BlockSpec(a.shape, lambda i: (0, 0))

    out = pl.pallas_call(
        mlp_kernel,
        out_shape=jax.ShapeDtypeStruct((1, b_pad), jnp.float32),
        grid_spec=pltpu.PrefetchScalarGridSpec(
            num_scalar_prefetch=0,
            grid=(b_pad // tm,),
            in_specs=[
                pl.BlockSpec((D, tm), lambda i: (0, i)),   # x.T tile (batch on lanes)
                full(w1), full(b1),
                full(w2), full(b2),
                full(w3), full(b3),
                full(w4), full(b4),
            ],
            out_specs=pl.BlockSpec((1, tm), lambda i: (0, i)),  # lane-dense stores
        ),
        compiler_params=pltpu.CompilerParams(
            dimension_semantics=("parallel",)),
    )(xT, w1, b1, w2, b2, w3, b3, w4, b4)

    return out[0, :B].reshape(B, 1)


def init_params(key, input_size):
    """Deterministic init mimicking nn.Linear (uniform +-1/sqrt(fan_in)).
    fc1..fc3 weights in native (out_features, in_features) layout, biases as
    (out_features, 1) columns; fc4 weight stored as a (32, 1) column."""
    dims = [(input_size, 128), (128, 64), (64, 32), (32, 1)]
    params = {}
    for idx, (fan_in, fan_out) in enumerate(dims, start=1):
        key, kw, kb = jax.random.split(key, 3)
        bound = float(fan_in) ** -0.5
        if idx < 4:
            w_shape, b_shape = (fan_out, fan_in), (fan_out, 1)
        else:
            w_shape, b_shape = (fan_in, fan_out), (1, 1)   # (32, 1) column, scalar bias
        params[f"w{idx}"] = jax.random.uniform(
            kw, w_shape, jnp.float32, -bound, bound)
        params[f"b{idx}"] = jax.random.uniform(
            kb, b_shape, jnp.float32, -bound, bound)
    return params


def reference_forward(x, params):
    h = jnp.maximum(x @ params["w1"].T + params["b1"].T, 0.0)
    h = jnp.maximum(h @ params["w2"].T + params["b2"].T, 0.0)
    h = jnp.maximum(h @ params["w3"].T + params["b3"].T, 0.0)
    return h @ params["w4"] + params["b4"]


if __name__ == "__main__":
    input_size = 16
    batch = 16

    key = jax.random.PRNGKey(0)
    key, kx = jax.random.split(key)
    x = jax.random.normal(kx, (batch, input_size), jnp.float32)
    params = init_params(key, input_size)

    out = jax.block_until_ready(temperature_model_forward(x, params))

    ref = reference_forward(x, params)
    assert out.shape == (batch, 1)
    assert jnp.allclose(out, ref, atol=1e-4, rtol=1e-4), "mismatch vs reference"

    print("KERNEL_OK")
</pallas_src>

<mosaic_0001>
module attributes {stable_mosaic.version = 11 : i64} {
  func.func @mlp_kernel(%arg0: i32, %arg1: memref<16x128xf32, #tpu.memory_space<vmem>>, %arg2: memref<128x16xf32, #tpu.memory_space<vmem>>, %arg3: memref<128x1xf32, #tpu.memory_space<vmem>>, %arg4: memref<64x128xf32, #tpu.memory_space<vmem>>, %arg5: memref<64x1xf32, #tpu.memory_space<vmem>>, %arg6: memref<32x64xf32, #tpu.memory_space<vmem>>, %arg7: memref<32x1xf32, #tpu.memory_space<vmem>>, %arg8: memref<32x1xf32, #tpu.memory_space<vmem>>, %arg9: memref<1x1xf32, #tpu.memory_space<vmem>>, %arg10: memref<1x128xf32, #tpu.memory_space<vmem>>) attributes {dimension_semantics = [#tpu.dimension_semantics<parallel>], iteration_bounds = array<i64: 1>, scalar_prefetch = 0 : i64, scratch_operands = 0 : i64, tpu.core_type = #tpu.core_type<tc>, window_params = [{transform_indices = @transform_0, window_bounds = array<i64: 16, 128>}, {pipeline_mode = #tpu.pipeline_mode<synchronous>, transform_indices = @transform_1, window_bounds = array<i64: 128, 16>}, {pipeline_mode = #tpu.pipeline_mode<synchronous>, transform_indices = @transform_2, window_bounds = array<i64: 128, 1>}, {pipeline_mode = #tpu.pipeline_mode<synchronous>, transform_indices = @transform_3, window_bounds = array<i64: 64, 128>}, {pipeline_mode = #tpu.pipeline_mode<synchronous>, transform_indices = @transform_4, window_bounds = array<i64: 64, 1>}, {pipeline_mode = #tpu.pipeline_mode<synchronous>, transform_indices = @transform_5, window_bounds = array<i64: 32, 64>}, {pipeline_mode = #tpu.pipeline_mode<synchronous>, transform_indices = @transform_6, window_bounds = array<i64: 32, 1>}, {pipeline_mode = #tpu.pipeline_mode<synchronous>, transform_indices = @transform_7, window_bounds = array<i64: 32, 1>}, {pipeline_mode = #tpu.pipeline_mode<synchronous>, transform_indices = @transform_8, window_bounds = array<i64: 1, 1>}, {transform_indices = @transform_9, window_bounds = array<i64: 1, 128>}]} {
    %c0 = arith.constant 0 : index
    %c0_0 = arith.constant 0 : index
    %0 = vector.load %arg1[%c0, %c0_0] : memref<16x128xf32, #tpu.memory_space<vmem>>, vector<16x128xf32>
    %c0_1 = arith.constant 0 : index
    %c0_2 = arith.constant 0 : index
    %1 = vector.load %arg2[%c0_1, %c0_2] : memref<128x16xf32, #tpu.memory_space<vmem>>, vector<128x16xf32>
    %cst = arith.constant dense<0.000000e+00> : vector<128x128xf32>
    %2 = tpu.matmul %1, %0, %cst {dimension_numbers = #tpu.dot_dimension_numbers<[1], [0], [0], [1], [0, 0, 1, 1], [], []>} : vector<128x16xf32>, vector<16x128xf32>, vector<128x128xf32> -> vector<128x128xf32>
    %c0_3 = arith.constant 0 : index
    %c0_4 = arith.constant 0 : index
    %3 = vector.load %arg3[%c0_3, %c0_4] : memref<128x1xf32, #tpu.memory_space<vmem>>, vector<128x1xf32>
    %4 = vector.broadcast %3 : vector<128x1xf32> to vector<128x128xf32>
    %5 = arith.addf %2, %4 : vector<128x128xf32>
    %cst_5 = arith.constant 0.000000e+00 : f32
    %6 = vector.broadcast %cst_5 : f32 to vector<128x128xf32>
    %7 = arith.maximumf %5, %6 : vector<128x128xf32>
    %c0_6 = arith.constant 0 : index
    %c0_7 = arith.constant 0 : index
    %8 = vector.load %arg4[%c0_6, %c0_7] : memref<64x128xf32, #tpu.memory_space<vmem>>, vector<64x128xf32>
    %cst_8 = arith.constant dense<0.000000e+00> : vector<64x128xf32>
    %9 = tpu.matmul %8, %7, %cst_8 {dimension_numbers = #tpu.dot_dimension_numbers<[1], [0], [0], [1], [0, 0, 1, 1], [], []>} : vector<64x128xf32>, vector<128x128xf32>, vector<64x128xf32> -> vector<64x128xf32>
    %c0_9 = arith.constant 0 : index
    %c0_10 = arith.constant 0 : index
    %10 = vector.load %arg5[%c0_9, %c0_10] : memref<64x1xf32, #tpu.memory_space<vmem>>, vector<64x1xf32>
    %11 = vector.broadcast %10 : vector<64x1xf32> to vector<64x128xf32>
    %12 = arith.addf %9, %11 : vector<64x128xf32>
    %cst_11 = arith.constant 0.000000e+00 : f32
    %13 = vector.broadcast %cst_11 : f32 to vector<64x128xf32>
    %14 = arith.maximumf %12, %13 : vector<64x128xf32>
    %c0_12 = arith.constant 0 : index
    %c0_13 = arith.constant 0 : index
    %15 = vector.load %arg6[%c0_12, %c0_13] : memref<32x64xf32, #tpu.memory_space<vmem>>, vector<32x64xf32>
    %cst_14 = arith.constant dense<0.000000e+00> : vector<32x128xf32>
    %16 = tpu.matmul %15, %14, %cst_14 {dimension_numbers = #tpu.dot_dimension_numbers<[1], [0], [0], [1], [0, 0, 1, 1], [], []>} : vector<32x64xf32>, vector<64x128xf32>, vector<32x128xf32> -> vector<32x128xf32>
    %c0_15 = arith.constant 0 : index
    %c0_16 = arith.constant 0 : index
    %17 = vector.load %arg7[%c0_15, %c0_16] : memref<32x1xf32, #tpu.memory_space<vmem>>, vector<32x1xf32>
    %18 = vector.broadcast %17 : vector<32x1xf32> to vector<32x128xf32>
    %19 = arith.addf %16, %18 : vector<32x128xf32>
    %cst_17 = arith.constant 0.000000e+00 : f32
    %20 = vector.broadcast %cst_17 : f32 to vector<32x128xf32>
    %21 = arith.maximumf %19, %20 : vector<32x128xf32>
    %c0_18 = arith.constant 0 : index
    %c0_19 = arith.constant 0 : index
    %22 = vector.load %arg8[%c0_18, %c0_19] : memref<32x1xf32, #tpu.memory_space<vmem>>, vector<32x1xf32>
    %23 = vector.broadcast %22 : vector<32x1xf32> to vector<32x128xf32>
    %24 = arith.mulf %21, %23 : vector<32x128xf32>
    %cst_20 = arith.constant dense<0.000000e+00> : vector<128xf32>
    %25 = vector.multi_reduction <add>, %24, %cst_20 [0] : vector<32x128xf32> to vector<128xf32>
    %26 = vector.shape_cast %25 : vector<128xf32> to vector<1x128xf32>
    %c0_21 = arith.constant 0 : index
    %c0_22 = arith.constant 0 : index
    %27 = vector.load %arg9[%c0_21, %c0_22] : memref<1x1xf32, #tpu.memory_space<vmem>>, vector<1x1xf32>
    %28 = vector.broadcast %27 : vector<1x1xf32> to vector<1x128xf32>
    %29 = arith.addf %26, %28 : vector<1x128xf32>
    %c0_23 = arith.constant 0 : index
    %c0_24 = arith.constant 0 : index
    %30 = vector.load %arg10[%c0_23, %c0_24] : memref<1x128xf32, #tpu.memory_space<vmem>>, vector<1x128xf32>
    tpu.vector_store %arg10[%c0_23, %c0_24], %29 {strides = array<i32>} : memref<1x128xf32, #tpu.memory_space<vmem>>, vector<1x128xf32>,
    return
  }
  func.func @transform_0(%arg0: i32) -> (i32, i32) {
    %c0_i32 = arith.constant 0 : i32
    %c0_i32_0 = arith.constant 0 : i32
    return %c0_i32, %arg0 : i32, i32
  }
  func.func @transform_1(%arg0: i32) -> (i32, i32) {
    %c0_i32 = arith.constant 0 : i32
    %c0_i32_0 = arith.constant 0 : i32
    %c0_i32_1 = arith.constant 0 : i32
    return %c0_i32, %c0_i32_0 : i32, i32
  }
  func.func @transform_2(%arg0: i32) -> (i32, i32) {
    %c0_i32 = arith.constant 0 : i32
    %c0_i32_0 = arith.constant 0 : i32
    %c0_i32_1 = arith.constant 0 : i32
    return %c0_i32, %c0_i32_0 : i32, i32
  }
  func.func @transform_3(%arg0: i32) -> (i32, i32) {
    %c0_i32 = arith.constant 0 : i32
    %c0_i32_0 = arith.constant 0 : i32
    %c0_i32_1 = arith.constant 0 : i32
    return %c0_i32, %c0_i32_0 : i32, i32
  }
  func.func @transform_4(%arg0: i32) -> (i32, i32) {
    %c0_i32 = arith.constant 0 : i32
    %c0_i32_0 = arith.constant 0 : i32
    %c0_i32_1 = arith.constant 0 : i32
    return %c0_i32, %c0_i32_0 : i32, i32
  }
  func.func @transform_5(%arg0: i32) -> (i32, i32) {
    %c0_i32 = arith.constant 0 : i32
    %c0_i32_0 = arith.constant 0 : i32
    %c0_i32_1 = arith.constant 0 : i32
    return %c0_i32, %c0_i32_0 : i32, i32
  }
  func.func @transform_6(%arg0: i32) -> (i32, i32) {
    %c0_i32 = arith.constant 0 : i32
    %c0_i32_0 = arith.constant 0 : i32
    %c0_i32_1 = arith.constant 0 : i32
    return %c0_i32, %c0_i32_0 : i32, i32
  }
  func.func @transform_7(%arg0: i32) -> (i32, i32) {
    %c0_i32 = arith.constant 0 : i32
    %c0_i32_0 = arith.constant 0 : i32
    %c0_i32_1 = arith.constant 0 : i32
    return %c0_i32, %c0_i32_0 : i32, i32
  }
  func.func @transform_8(%arg0: i32) -> (i32, i32) {
    %c0_i32 = arith.constant 0 : i32
    %c0_i32_0 = arith.constant 0 : i32
    %c0_i32_1 = arith.constant 0 : i32
    return %c0_i32, %c0_i32_0 : i32, i32
  }
  func.func @transform_9(%arg0: i32) -> (i32, i32) {
    %c0_i32 = arith.constant 0 : i32
    %c0_i32_0 = arith.constant 0 : i32
    return %c0_i32, %arg0 : i32, i32
  }
}

</mosaic_0001>

<bundles_post_ra>
// kernel: tpu_custom_call.1
= control target key start
LH: loop header
LB: loop body
LE: loop exit
PB: predicated region body
PF: predicated region fallthrough
CT: control target
= control target key end

     0   :  { %s1191_s0 = inlined_call_operand.vmem [shape: f32[16,128], index: 0, kind: input, shape index: {}]   ;;  %s1192_s1 = inlined_call_operand.vmem [shape: f32[128,16], index: 1, kind: input, shape index: {}]   ;;  %s1193_s2 = inlined_call_operand.vmem [shape: f32[128,1], index: 2, kind: input, shape index: {}]   ;;  %s1194_s3 = inlined_call_operand.vmem [shape: f32[64,128], index: 3, kind: input, shape index: {}]   ;;  %s1195_s4 = inlined_call_operand.vmem [shape: f32[64,1], index: 4, kind: input, shape index: {}]   ;;  %s1196_s5 = inlined_call_operand.vmem [shape: f32[32,64], index: 5, kind: input, shape index: {}]   ;;  %s1197_s6 = inlined_call_operand.vmem [shape: f32[32,1], index: 6, kind: input, shape index: {}]   ;;  %s1198_s7 = inlined_call_operand.vmem [shape: f32[32,1], index: 7, kind: input, shape index: {}]   ;;  %s1199_s8 = inlined_call_operand.<no memory space> [shape: f32[1,1], index: 8, kind: input, shape index: {}]   ;;  %s1200_s9 = inlined_call_operand.hbm [shape: f32[1,128], index: 9, kind: output, shape index: {}]  }
   0x1   :  { %v14_v0 = vstv %s1199_s8 }
   0x2   :  { %15 = vst [vmem:[#allocation2] sm:$0x1] %v14_v0 }
   0x3   :  { %v36_v1 = vld [vmem:[%s1191_s0 + $0x8] sm:$0xff]  ;;  %v35_v2 = vld [vmem:[%s1191_s0] sm:$0xff]  ;;  %vm149_vm0 = vcmask 130048   ;;  %v915_v5 = vmov 0   ;;  %v39_v6 = vld [vmem:[%s1192_s1 + $0x10] sm:$0xff] }
   0x4   :  { %v37_v3 = vld [vmem:[%s1192_s1] sm:$0xff]  ;;  %795 = vmatprep.subr.mxu0 %v36_v1  ;;  %v38_v4 = vld [vmem:[%s1192_s1 + $0x8] sm:$0xff]  ;;  %891 = vset.pattern.permute.xlu0 %v915_v5  ;;  %v40_v7 = vld [vmem:[%s1192_s1 + $0x18] sm:$0xff] }
   0x5   :  { %799 = vmatprep.mubr.msk.f32.mxu0 %vm149_vm0, %v37_v3  ;;  %796 = vmatpush3.msra.mxu0 %v36_v1  ;;  %v68_v8 = vld [vmem:[%s1193_s2 + $0x78] sm:$0xff]  ;;  %v66_v9 = vld [vmem:[%s1193_s2 + $0x68] sm:$0xff]  ;;  %v41_v10 = vld [vmem:[%s1192_s1 + $0x20] sm:$0xff] }
   0x6   :  { %797 = vmatprep.subr.mxu0 %v35_v2  ;;  %892 = vset.pattern.permute.xlu1 %v915_v5  ;;  %v67_v11 = vld [vmem:[%s1193_s2 + $0x70] sm:$0xff]  ;;  %v65_v12 = vld [vmem:[%s1193_s2 + $0x60] sm:$0xff]  ;;  %v42_v13 = vld [vmem:[%s1192_s1 + $0x28] sm:$0xff] }
   0x7   :  { %798 = vmatpush3.msra.mxu0 %v35_v2  ;;  %146 = vperm.xlu0 %891, %v68_v8   ;;  %v43_v14 = vld [vmem:[%s1192_s1 + $0x30] sm:$0xff]  ;;  %v64_v15 = vld [vmem:[%s1193_s2 + $0x58] sm:$0xff]  ;;  %v45_v18 = vld [vmem:[%s1192_s1 + $0x40] sm:$0xff] }
   0x8   :  { %800 = vmatmul.mubr.msk.f32.vlgmr.msra.gmra.mxu0 %vm149_vm0, %v38_v4  ;;  %136 = vperm.xlu1 %892, %v66_v9   ;;  %v63_v16 = vld [vmem:[%s1193_s2 + $0x50] sm:$0xff]  ;;  %v44_v17 = vld [vmem:[%s1192_s1 + $0x38] sm:$0xff]  ;;  %v62_v19 = vld [vmem:[%s1193_s2 + $0x48] sm:$0xff] }
   0x9   :  { %802 = vmatprep.mubr.msk.f32.mxu0 %vm149_vm0, %v39_v6  ;;  %v61_v20 = vld [vmem:[%s1193_s2 + $0x40] sm:$0xff] }
   0xb   :  { %141 = vperm.xlu0 %891, %v67_v11  }
   0xc   :  { %803 = vmatmul.mubr.msk.f32.gmra.mxu0 %vm149_vm0, %v40_v7  ;;  %131 = vperm.xlu1 %892, %v65_v12  }
   0xd   :  { %805 = vmatprep.mubr.msk.f32.mxu0 %vm149_vm0, %v41_v10 }
   0xf   :  { %126 = vperm.xlu0 %891, %v64_v15  }
  0x10   :  { %806 = vmatmul.mubr.msk.f32.gmra.mxu0 %vm149_vm0, %v42_v13  ;;  %121 = vperm.xlu1 %892, %v63_v16  }
  0x11   :  { %808 = vmatprep.mubr.msk.f32.mxu0 %vm149_vm0, %v43_v14 }
  0x14   :  { %809 = vmatmul.mubr.msk.f32.gmra.mxu0 %vm149_vm0, %v44_v17 }
  0x15   :  { %16 = vsyncpa [#allocation4], 0  ;;  %811 = vmatprep.mubr.msk.f32.mxu0 %vm149_vm0, %v45_v18  ;;  %v46_v21 = vld [vmem:[%s1192_s1 + $0x48] sm:$0xff]  ;;  %v47_v22 = vld [vmem:[%s1192_s1 + $0x50] sm:$0xff]  ;;  %116 = vperm.xlu0 %891, %v62_v19   ;;  %vm556_vm1 = vcmask 523264  }
  0x16   :  { %111 = vperm.xlu1 %892, %v61_v20   ;;  %v60_v23 = vld [vmem:[%s1193_s2 + $0x38] sm:$0xff]  ;;  %v59_v24 = vld [vmem:[%s1193_s2 + $0x30] sm:$0xff]  ;;  %v49_v26 = vld [vmem:[%s1192_s1 + $0x60] sm:$0xff] }
  0x17   :  { %v48_v25 = vld [vmem:[%s1192_s1 + $0x58] sm:$0xff]  ;;  %v58_v27 = vld [vmem:[%s1193_s2 + $0x28] sm:$0xff]  ;;  %v57_v28 = vld [vmem:[%s1193_s2 + $0x20] sm:$0xff] }
  0x18   :  { %812 = vmatmul.mubr.msk.f32.gmra.mxu0 %vm149_vm0, %v46_v21  ;;  %v50_v29 = vld [vmem:[%s1192_s1 + $0x68] sm:$0xff]  ;;  %v51_v30 = vld [vmem:[%s1192_s1 + $0x70] sm:$0xff]  ;;  %v56_v31 = vld [vmem:[%s1193_s2 + $0x18] sm:$0xff] }
  0x19   :  { %814 = vmatprep.mubr.msk.f32.mxu0 %vm149_vm0, %v47_v22  ;;  %106 = vperm.xlu0 %891, %v60_v23   ;;  %v55_v32 = vld [vmem:[%s1193_s2 + $0x10] sm:$0xff]  ;;  %v52_v33 = vld [vmem:[%s1192_s1 + $0x78] sm:$0xff]  ;;  %v54_v34 = vld [vmem:[%s1193_s2 + $0x8] sm:$0xff] }
  0x1a   :  { %101 = vperm.xlu1 %892, %v59_v24   ;;  %v53_v35 = vld [vmem:[%s1193_s2] sm:$0xff]  ;;  %v374_v36 = vld [vmem:[%s1195_s4 + $0x38] sm:$0xff]  ;;  %v373_v37 = vld [vmem:[%s1195_s4 + $0x30] sm:$0xff] }
  0x1b   :  { %v372_v38 = vld [vmem:[%s1195_s4 + $0x28] sm:$0xff]  ;;  %v371_v39 = vld [vmem:[%s1195_s4 + $0x20] sm:$0xff]  ;;  %v370_v40 = vld [vmem:[%s1195_s4 + $0x18] sm:$0xff] }
  0x1c   :  { %815 = vmatmul.mubr.msk.f32.gmra.mxu0 %vm149_vm0, %v48_v25  ;;  %v369_v41 = vld [vmem:[%s1195_s4 + $0x10] sm:$0xff]  ;;  %v368_v42 = vld [vmem:[%s1195_s4 + $0x8] sm:$0xff]  ;;  %v367_v43 = vld [vmem:[%s1195_s4] sm:$0xff] }
  0x1d   :  { %817 = vmatprep.mubr.msk.f32.mxu0 %vm149_vm0, %v49_v26  ;;  %96 = vperm.xlu0 %891, %v58_v27   ;;  %v532_v44 = vld [vmem:[%s1197_s6] sm:$0xff]  ;;  %v533_v45 = vld [vmem:[%s1197_s6 + $0x8] sm:$0xff]  ;;  %v534_v46 = vld [vmem:[%s1197_s6 + $0x10] sm:$0xff] }
  0x1e   :  { %91 = vperm.xlu1 %892, %v57_v28   ;;  %v535_v47 = vld [vmem:[%s1197_s6 + $0x18] sm:$0xff]  ;;  %v658_v48 = vld [vmem:[%s1198_s7] sm:$0xff]  ;;  %v659_v49 = vld [vmem:[%s1198_s7 + $0x8] sm:$0xff] }
  0x1f   :  { %v660_v50 = vld [vmem:[%s1198_s7 + $0x10] sm:$0xff]  ;;  %v661_v51 = vld [vmem:[%s1198_s7 + $0x18] sm:$0xff]  ;;  %v695_v52 = vld [vmem:[#allocation2] sm:$0x1] }
  0x20   :  { %818 = vmatmul.mubr.msk.f32.gmra.mxu0 %vm149_vm0, %v50_v29  ;;  %v359_v53 = vld [vmem:[%s1194_s3] sm:$0xff] }
  0x21   :  { %820 = vmatprep.mubr.msk.f32.mxu0 %vm149_vm0, %v51_v30  ;;  %86 = vperm.xlu0 %891, %v56_v31  }
  0x22   :  { %81 = vperm.xlu1 %892, %v55_v32   ;;  %855 = vmatprep.mubr.f32.mxu1 %v359_v53 }
  0x24   :  { %821 = vmatmul.mubr.msk.f32.gmra.mxu0 %vm149_vm0, %v52_v33 }
  0x25   :  { %76 = vperm.xlu0 %891, %v54_v34  }
  0x26   :  { %71 = vperm.xlu1 %892, %v53_v35  }
  0x29   :  { %412 = vperm.xlu0 %891, %v374_v36  }
  0x2a   :  { %407 = vperm.xlu1 %892, %v373_v37  }
  0x2d   :  { %402 = vperm.xlu0 %891, %v372_v38  }
  0x2e   :  { %397 = vperm.xlu1 %892, %v371_v39  }
  0x31   :  { %392 = vperm.xlu0 %891, %v370_v40  }
  0x32   :  { %387 = vperm.xlu1 %892, %v369_v41  }
  0x35   :  { %382 = vperm.xlu0 %891, %v368_v42  }
  0x36   :  { %377 = vperm.xlu1 %892, %v367_v43  }
  0x39   :  { %538 = vperm.xlu0 %891, %v532_v44  }
  0x3a   :  { %543 = vperm.xlu1 %892, %v533_v45  }
  0x3d   :  { %548 = vperm.xlu0 %891, %v534_v46  }
  0x3e   :  { %553 = vperm.xlu1 %892, %v535_v47  }
  0x41   :  { %664 = vperm.xlu0 %891, %v658_v48  }
  0x42   :  { %669 = vperm.xlu1 %892, %v659_v49  }
  0x45   :  { %674 = vperm.xlu0 %891, %v660_v50  }
  0x46   :  { %679 = vperm.xlu1 %892, %v661_v51  }
  0x49   :  { %698 = vperm.xlu0 %891, %v695_v52  }
  0x82   :  { %v147_v60 = vpop.permute.xlu0 %146 }
  0x83   :  { %v137_v62 = vpop.permute.xlu1 %136 }
  0x86   :  { %v142_v1 = vpop.permute.xlu0 %141 }
  0x87   :  { %v132_v3 = vpop.permute.xlu1 %131 }
  0x8a   :  { %v127_v6 = vpop.permute.xlu0 %126 }
  0x8b   :  { %v122_v8 = vpop.permute.xlu1 %121 }
  0x90   :  { %v117_v12 = vpop.permute.xlu0 %116 }
  0x91   :  { %v112_v17 = vpop.permute.xlu1 %111 }
  0x94   :  { %v107_v22 = vpop.permute.xlu0 %106 }
  0x95   :  { %v102_v25 = vpop.permute.xlu1 %101 }
  0x98   :  { %v97_v30 = vpop.permute.xlu0 %96 }
  0x99   :  { %v92_v33 = vpop.permute.xlu1 %91 }
  0x9c   :  { %v87_v38 = vpop.permute.xlu0 %86 }
  0x9d   :  { %v82_v41 = vpop.permute.xlu1 %81 }
  0xa0   :  { %v77_v46 = vpop.permute.xlu0 %76 }
  0xa1   :  { %v72_v49 = vpop.permute.xlu1 %71 }
  0xc8   :  { %v1139_v54 = vpop.f32.mrf.mxu0 }
  0xc9   :  { %v270_v47 = vadd.f32 %v1139_v54, %v77_v46  ;;  %v361_v54 = vld [vmem:[%s1194_s3 + $0x10] sm:$0xff] }
  0xca   :  { %v1141_v55 = vpop.f32.mrf.mxu0 }
  0xcb   :  { %v265_v50 = vadd.f32 %v1141_v55, %v72_v49  ;;  %v344_v52 = vmax.f32 %v270_v47, 0.0  ;;  %v362_v55 = vld [vmem:[%s1194_s3 + $0x18] sm:$0xff] }
  0xcc   :  { %v1143_v56 = vpop.f32.mrf.mxu0 }
  0xcd   :  { %v280_v42 = vadd.f32 %v1143_v56, %v87_v38  ;;  %v343_v53 = vmax.f32 %v265_v50, 0.0  ;;  %v360_v56 = vld [vmem:[%s1194_s3 + $0x8] sm:$0xff] }
  0xce   :  { %v1145_v57 = vpop.f32.mrf.mxu0 }
  0xcf   :  { %v275_v44 = vadd.f32 %v1145_v57, %v82_v41  ;;  %v346_v48 = vmax.f32 %v280_v42, 0.0  ;;  %v363_v57 = vld [vmem:[%s1194_s3 + $0x20] sm:$0xff] }
  0xd0   :  { %v807_v58 = vpop.f32.mrf.mxu0 }
  0xd1   :  { %v290_v36 = vadd.f32 %v807_v58, %v97_v30  ;;  %v345_v51 = vmax.f32 %v275_v44, 0.0  ;;  %v364_v58 = vld [vmem:[%s1194_s3 + $0x28] sm:$0xff] }
  0xd2   :  { %v284_v59 = vpop.f32.mrf.mxu0  ;;  %v529_v30 = vld [vmem:[%s1196_s5 + $0x8] sm:$0xff] }
  0xd3   :  { %v285_v39 = vadd.f32 %v284_v59, %v92_v33  ;;  %v348_v43 = vmax.f32 %v290_v36, 0.0  ;;  %v365_v59 = vld [vmem:[%s1194_s3 + $0x30] sm:$0xff] }
  0xd4   :  { %v810_v61 = vpop.f32.mrf.mxu0 }
  0xd5   :  { %v300_v31 = vadd.f32 %v810_v61, %v107_v22  ;;  %v347_v45 = vmax.f32 %v285_v39, 0.0  ;;  %v528_v61 = vld [vmem:[%s1196_s5] sm:$0xff] }
  0xd6   :  { %v294_v63 = vpop.f32.mrf.mxu0  ;;  %883 = vmatprep.mubr.msk.f32.mxu0 %vm556_vm1, %v528_v61 }
  0xd7   :  { %v295_v34 = vadd.f32 %v294_v63, %v102_v25  ;;  %v350_v37 = vmax.f32 %v300_v31, 0.0  ;;  %v530_v31 = vld [vmem:[%s1196_s5 + $0x10] sm:$0xff] }
  0xd8   :  { %v813_v0 = vpop.f32.mrf.mxu0 }
  0xd9   :  { %v310_v26 = vadd.f32 %v813_v0, %v117_v12  ;;  %v349_v40 = vmax.f32 %v295_v34, 0.0  ;;  %v413_v0 = vpop.permute.xlu0 %412 }
  0xda   :  { %v304_v2 = vpop.f32.mrf.mxu0 }
  0xdb   :  { %v305_v28 = vadd.f32 %v304_v2, %v112_v17  ;;  %v352_v32 = vmax.f32 %v310_v26, 0.0  ;;  %v408_v2 = vpop.permute.xlu1 %407 }
  0xdc   :  { %v816_v4 = vpop.f32.mrf.mxu0 }
  0xdd   :  { %v320_v20 = vadd.f32 %v816_v4, %v127_v6  ;;  %v351_v35 = vmax.f32 %v305_v28, 0.0 }
  0xde   :  { %v314_v5 = vpop.f32.mrf.mxu0 }
  0xdf   :  { %v315_v23 = vadd.f32 %v314_v5, %v122_v8  ;;  %v354_v27 = vmax.f32 %v320_v20, 0.0  ;;  %v403_v5 = vpop.permute.xlu0 %402 }
  0xe0   :  { %v819_v7 = vpop.f32.mrf.mxu0 }
  0xe1   :  { %v330_v14 = vadd.f32 %v819_v7, %v137_v62  ;;  %v353_v29 = vmax.f32 %v315_v23, 0.0  ;;  %v398_v7 = vpop.permute.xlu1 %397 }
  0xe2   :  { %v324_v9 = vpop.f32.mrf.mxu0 }
  0xe3   :  { %v325_v18 = vadd.f32 %v324_v9, %v132_v3  ;;  %v356_v21 = vmax.f32 %v330_v14, 0.0  ;;  %v393_v14 = vpop.permute.xlu0 %392 }
  0xe4   :  { %v822_v10 = vpop.f32.mrf.mxu0 }
  0xe5   :  { %v340_v11 = vadd.f32 %v822_v10, %v147_v60  ;;  %v355_v24 = vmax.f32 %v325_v18, 0.0  ;;  %v366_v60 = vld [vmem:[%s1194_s3 + $0x38] sm:$0xff]  ;;  %v388_v17 = vpop.permute.xlu1 %387 }
  0xe6   :  { %v334_v13 = vpop.f32.mrf.mxu0 }
  0xe7   :  { %v358_v15 = vmax.f32 %v340_v11, 0.0  ;;  %v335_v16 = vadd.f32 %v334_v13, %v142_v1  ;;  %v383_v22 = vpop.permute.xlu0 %382 }
  0xe9   :  { %v357_v19 = vmax.f32 %v335_v16, 0.0  ;;  %823 = vmatprep.subr.mxu1 %v358_v15  ;;  %v378_v25 = vpop.permute.xlu1 %377 }
  0xea   :  { %824 = vmatpush3.msra.mxu1 %v358_v15 }
  0xeb   :  { %825 = vmatprep.subr.mxu1 %v357_v19  ;;  %v539_v33 = vpop.permute.xlu0 %538 }
  0xec   :  { %826 = vmatpush3.msra.mxu1 %v357_v19 }
  0xed   :  { %827 = vmatprep.subr.mxu1 %v356_v21  ;;  %v544_v34 = vpop.permute.xlu1 %543 }
  0xee   :  { %828 = vmatpush3.msra.mxu1 %v356_v21 }
  0xef   :  { %829 = vmatprep.subr.mxu1 %v355_v24 }
  0xf0   :  { %830 = vmatpush3.msra.mxu1 %v355_v24 }
  0xf1   :  { %831 = vmatprep.subr.mxu1 %v354_v27  ;;  %v554_v36 = vpop.permute.xlu1 %553 }
  0xf2   :  { %832 = vmatpush3.msra.mxu1 %v354_v27 }
  0xf3   :  { %833 = vmatprep.subr.mxu1 %v353_v29 }
  0xf4   :  { %834 = vmatpush3.msra.mxu1 %v353_v29 }
  0xf5   :  { %835 = vmatprep.subr.mxu1 %v352_v32  ;;  %v670_v46 = vpop.permute.xlu1 %669 }
  0xf6   :  { %836 = vmatpush3.msra.mxu1 %v352_v32  ;;  %v531_v32 = vld [vmem:[%s1196_s5 + $0x18] sm:$0xff]  ;;  %s916_s5 = smov [#allocation3]  }
  0xf7   :  { %837 = vmatprep.subr.mxu1 %v351_v35  ;;  %s713_s11 = sshll.u32 %s916_s5, 4  ;;  %s714_s11 = int_to_ptr.vmem [resolvable:$true] %s713_s11 }
  0xf8   :  { %838 = vmatpush3.msra.mxu1 %v351_v35  ;;  %v549_v35 = vpop.permute.xlu0 %548  ;;  %s893_s12 = scalar_lea.vmem %s714_s11, 16  ;;  %s897_s1 = scalar_lea.vmem %s714_s11, 32 }
  0xf9   :  { %839 = vmatprep.subr.mxu1 %v350_v37  ;;  %p894_p0 = scmp.ne.s32.totalorder %s714_s11, %s893_s12  ;;  %p898_p1 = scmp.lt.s32.totalorder %s714_s11, %s714_s11 }
  0xfa   :  { %840 = vmatpush3.msra.mxu1 %v350_v37  ;;  %p899_p2 = scmp.lt.s32.totalorder %s897_s1, %s893_s12 }
  0xfb   :  { %841 = vmatprep.subr.mxu1 %v349_v40 }
  0xfc   :  { %842 = vmatpush3.msra.mxu1 %v349_v40  ;;  %v665_v41 = vpop.permute.xlu0 %664  ;;  %p900_p3 = por %p899_p2, %p898_p1 }
  0xfd   :  { %843 = vmatprep.subr.mxu1 %v348_v43 }
  0xfe   :  { %844 = vmatpush3.msra.mxu1 %v348_v43  ;;  %p901_p4 = pnand %p900_p3, %p894_p0 }
  0xff   :  { %845 = vmatprep.subr.mxu1 %v347_v45 }
 0x100   :  { %846 = vmatpush3.msra.mxu1 %v347_v45 }
 0x101   :  { %847 = vmatprep.subr.mxu1 %v346_v48 }
 0x102   :  { %848 = vmatpush3.msra.mxu1 %v346_v48 }
 0x103   :  { %849 = vmatprep.subr.mxu1 %v345_v51 }
 0x104   :  { %850 = vmatpush3.msra.mxu1 %v345_v51 }
 0x105   :  { %851 = vmatprep.subr.mxu1 %v344_v52 }
 0x106   :  { %852 = vmatpush3.msra.mxu1 %v344_v52 }
 0x107   :  { %853 = vmatprep.subr.mxu1 %v343_v53 }
 0x108   :  { %854 = vmatpush3.msra.mxu1 %v343_v53  ;;  %v675_v53 = vpop.permute.xlu0 %674 }
 0x109   :  { %856 = vmatmul.mubr.f32.vlgmr.msra.gmra.mxu1 %v360_v56 }
 0x10a   :  { %858 = vmatprep.mubr.f32.mxu1 %v361_v54 }
 0x10d   :  { %859 = vmatmul.mubr.f32.gmra.mxu1 %v362_v55  ;;  %v680_v55 = vpop.permute.xlu1 %679 }
 0x10e   :  { %861 = vmatprep.mubr.f32.mxu1 %v363_v57 }
 0x111   :  { %862 = vmatmul.mubr.f32.gmra.mxu1 %v364_v58 }
 0x112   :  { %864 = vmatprep.mubr.f32.mxu1 %v365_v59  ;;  %v701_v59 = vlaneseq }
 0x115   :  { %865 = vmatmul.mubr.f32.gmra.mxu1 %v366_v60 }
 0x1c9   :  { %v857_v62 = vpop.f32.mrf.mxu1 }
 0x1ca   :  { %v487_v23 = vadd.f32 %v857_v62, %v383_v22  ;;  %v702_v62 = vshrl.u32 %v701_v59, 7 }
 0x1cb   :  { %v481_v63 = vpop.f32.mrf.mxu1 }
 0x1cc   :  { %v482_v26 = vadd.f32 %v481_v63, %v378_v25  ;;  %v521_v28 = vmax.f32 %v487_v23, 0.0 }
 0x1cd   :  { %v860_v1 = vpop.f32.mrf.mxu1 }
 0x1ce   :  { %v497_v18 = vadd.f32 %v860_v1, %v393_v14  ;;  %v520_v29 = vmax.f32 %v482_v26, 0.0  ;;  %v703_v1 = vsub.s32 0, %v702_v62 }
 0x1cf   :  { %v491_v3 = vpop.f32.mrf.mxu1 }
 0x1d0   :  { %v492_v20 = vadd.f32 %v491_v3, %v388_v17  ;;  %v523_v24 = vmax.f32 %v497_v18, 0.0  ;;  %v699_v3 = vpop.permute.xlu0 %698 }
 0x1d1   :  { %v863_v4 = vpop.f32.mrf.mxu1 }
 0x1d2   :  { %v507_v11 = vadd.f32 %v863_v4, %v403_v5  ;;  %v522_v27 = vmax.f32 %v492_v20, 0.0  ;;  %v704_v5 = vrot.slane %v699_v3, %v703_v1 }
 0x1d3   :  { %v501_v6 = vpop.f32.mrf.mxu1 }
 0x1d4   :  { %v502_v15 = vadd.f32 %v501_v6, %v398_v7  ;;  %v525_v19 = vmax.f32 %v507_v11, 0.0 }
 0x1d5   :  { %v866_v8 = vpop.f32.mrf.mxu1 }
 0x1d6   :  { %v517_v9 = vadd.f32 %v866_v8, %v413_v0  ;;  %v524_v21 = vmax.f32 %v502_v15, 0.0 }
 0x1d7   :  { %v511_v10 = vpop.f32.mrf.mxu1 }
 0x1d8   :  { %v527_v12 = vmax.f32 %v517_v9, 0.0  ;;  %v512_v13 = vadd.f32 %v511_v10, %v408_v2 }
 0x1da   :  { %v526_v16 = vmax.f32 %v512_v13, 0.0  ;;  %867 = vmatprep.subr.mxu0 %v527_v12 }
 0x1db   :  { %868 = vmatpush3.msra.mxu0 %v527_v12 }
 0x1dc   :  { %869 = vmatprep.subr.mxu0 %v526_v16 }
 0x1dd   :  { %870 = vmatpush3.msra.mxu0 %v526_v16 }
 0x1de   :  { %871 = vmatprep.subr.mxu0 %v525_v19 }
 0x1df   :  { %872 = vmatpush3.msra.mxu0 %v525_v19 }
 0x1e0   :  { %873 = vmatprep.subr.mxu0 %v524_v21 }
 0x1e1   :  { %874 = vmatpush3.msra.mxu0 %v524_v21 }
 0x1e2   :  { %875 = vmatprep.subr.mxu0 %v523_v24 }
 0x1e3   :  { %876 = vmatpush3.msra.mxu0 %v523_v24 }
 0x1e4   :  { %877 = vmatprep.subr.mxu0 %v522_v27 }
 0x1e5   :  { %878 = vmatpush3.msra.mxu0 %v522_v27 }
 0x1e6   :  { %879 = vmatprep.subr.mxu0 %v521_v28 }
 0x1e7   :  { %880 = vmatpush3.msra.mxu0 %v521_v28 }
 0x1e8   :  { %881 = vmatprep.subr.mxu0 %v520_v29 }
 0x1e9   :  { %882 = vmatpush3.msra.mxu0 %v520_v29 }
 0x1ea   :  { %884 = vmatmul.mubr.msk.f32.vlgmr.msra.gmra.mxu0 %vm556_vm1, %v529_v30 }
 0x1eb   :  { %886 = vmatprep.mubr.msk.f32.mxu0 %vm556_vm1, %v530_v31 }
 0x1ee   :  { %887 = vmatmul.mubr.msk.f32.gmra.mxu0 %vm556_vm1, %v531_v32 }
 0x2aa   :  { %v885_v37 = vpop.f32.mrf.mxu0 }
 0x2ab   :  { %v641_v38 = vadd.f32 %v885_v37, %v544_v34 }
 0x2ac   :  { %v635_v39 = vpop.f32.mrf.mxu0 }
 0x2ad   :  { %v636_v40 = vadd.f32 %v635_v39, %v539_v33  ;;  %v655_v43 = vmax.f32 %v641_v38, 0.0 }
 0x2ae   :  { %v888_v42 = vpop.f32.mrf.mxu0 }
 0x2af   :  { %v654_v44 = vmax.f32 %v636_v40, 0.0  ;;  %v651_v45 = vadd.f32 %v888_v42, %v554_v36  ;;  %v683_v50 = vmul.f32 %v670_v46, %v655_v43 }
 0x2b0   :  { %v645_v47 = vpop.f32.mrf.mxu0 }
 0x2b1   :  { %v682_v48 = vmul.f32 %v665_v41, %v654_v44  ;;  %v646_v49 = vadd.f32 %v645_v47, %v549_v35  ;;  %v657_v51 = vmax.f32 %v651_v45, 0.0 }
 0x2b3   :  { %v656_v52 = vmax.f32 %v646_v49, 0.0  ;;  %v686_v56 = vadd.f32 %v683_v50, %v682_v48  ;;  %v685_v57 = vmul.f32 %v680_v55, %v657_v51 }
 0x2b5   :  { %v684_v54 = vmul.f32 %v675_v53, %v656_v52 }
 0x2b7   :  { %v687_v58 = vadd.f32 %v686_v56, %v684_v54 }
 0x2b9   :  { %v688_v60 = vadd.f32 %v687_v58, %v685_v57 }
 0x2bb   :  { %v689_v61 = vrot.slane %v688_v60, 4 }
 0x2bd   :  { %v690_v63 = vadd.f32 %v689_v61, %v688_v60 }
 0x2bf   :  { %v691_v0 = vrot.slane %v690_v63, 2 }
 0x2c1   :  { %v692_v2 = vadd.f32 %v691_v0, %v690_v63 }
 0x2c3   :  { %v693_v4 = vrot.slane %v692_v2, 1 }
 0x2c5   :  { %v694_v6 = vadd.f32 %v693_v4, %v692_v2 }
 0x2c7   :  { %v705_v7 = vadd.f32 %v704_v5, %v694_v6 }
 0x2c9   :  { %706 = vst [vmem:[#allocation3] sm:$0x1] %v705_v7 }
 0x2ca   :  { %904 = shalt.err (!%p901_p4)
}
 0x2cb   :  { %716 = dma.vmem_to_hbm [thread:$0]  %s714_s11, 16, %s1200_s9, [#allocation4]  }
 0x2cc   :  { %913 = dma.done.wait [#allocation4], 16  }
 0x2cd   :  { %914 = vsyncadd [#allocation4], 4294967280 }
 0x2ce   :  { %720 = vsyncpa [#allocation4], 1 }

</bundles_post_ra>
